<compile_context>
chip_gen: v5e
topology: v5e:2x2
jax: 0.10.0
libtpu: 0.0.40
codegen_flags: <defaults>
</compile_context>

<pallas_src>
import functools

import jax
import jax.numpy as jnp
from jax.experimental import pallas as pl
from jax.experimental.pallas import tpu as pltpu

_MiB = 1024 * 1024


def _round_up(x, m):
    return (x + m - 1) // m * m


def _cdiv(a, b):
    return (a + b - 1) // b


@functools.lru_cache(maxsize=1)
def _vmem_capacity_bytes():
    """Per-core physical VMEM; falls back to 64 MiB (v7x) if the query fails."""
    try:
        cap = int(pltpu.get_tpu_info().vmem_capacity_bytes)
        if cap > 0:
            return cap
    except Exception:
        pass
    return 64 * _MiB


def _apply_activation(y, activation):
    if activation is None:
        return y
    if activation == "relu":
        return jnp.maximum(y, 0.0)
    if activation == "tanh":
        return jnp.tanh(y)
    raise ValueError(f"unsupported activation: {activation}")


# ==========================================================================
# Single linear layer: y = activation(x @ w_t + b), w_t pre-transposed (K, N)
# ==========================================================================
def _small_linear_kernel(x_ref, w_ref, b_ref, o_ref, *, activation, compute_dtype):
    """Whole problem in one block: no grid, no padding."""
    acc = jnp.dot(
        x_ref[...].astype(compute_dtype),
        w_ref[...].astype(compute_dtype),
        preferred_element_type=jnp.float32,
    )
    y = acc + b_ref[...].astype(jnp.float32)
    o_ref[...] = _apply_activation(y, activation).astype(o_ref.dtype)


def _tiled_linear_kernel(x_ref, w_ref, b_ref, o_ref, acc_ref, *, activation,
                         compute_dtype):
    k = pl.program_id(2)

    @pl.when(k == 0)
    def _():
        acc_ref[...] = jnp.zeros_like(acc_ref)

    acc_ref[...] += jnp.dot(
        x_ref[...].astype(compute_dtype),
        w_ref[...].astype(compute_dtype),
        preferred_element_type=jnp.float32,
    )

    @pl.when(k == pl.num_programs(2) - 1)
    def _():
        y = acc_ref[...] + b_ref[...].astype(jnp.float32)
        o_ref[...] = _apply_activation(y, activation).astype(o_ref.dtype)


def _pick_tile(dim, align, max_tile):
    """Large tiles but tight padding: split the (aligned) dim evenly."""
    d = _round_up(dim, align)
    n = _cdiv(d, max_tile)
    t = _round_up(_cdiv(d, n), align)
    return t, n * t


def pallas_linear(x, w_t, b2d, activation=None, *, compute_dtype=jnp.bfloat16,
                  tm=256, tn=512, tk=2048):
    """Linear (+ fused activation). w_t is (in, out); b2d is (1, out)."""
    M, K = x.shape
    Kw, N = w_t.shape
    assert K == Kw, (K, Kw)
    cap = _vmem_capacity_bytes()
    x_item = x.dtype.itemsize
    w_item = w_t.dtype.itemsize

    # ---- small-head fast path: one block, no padding, no grid ------------
    small_bytes = M * K * x_item + K * N * w_item + N * 4 + M * N * x_item
    if small_bytes <= min(10 * _MiB, cap // 4):
        return pl.pallas_call(
            functools.partial(_small_linear_kernel, activation=activation,
                              compute_dtype=compute_dtype),
            out_shape=jax.ShapeDtypeStruct((M, N), x.dtype),
            compiler_params=pltpu.CompilerParams(
                vmem_limit_bytes=min(32 * _MiB, (cap * 3) // 4)),
        )(x, w_t, b2d)

    # ---- tiled, pipelined path --------------------------------------------
    tm, Mp = _pick_tile(M, 8, tm)
    tn, Np = _pick_tile(N, 128, tn)
    tk, Kp = _pick_tile(K, 128, tk)

    xp = jnp.pad(x, ((0, Mp - M), (0, Kp - K))) if (Mp != M or Kp != K) else x
    wp = jnp.pad(w_t, ((0, Kp - K), (0, Np - N))) if (Kp != K or Np != N) else w_t
    bp = jnp.pad(b2d, ((0, 0), (0, Np - N))) if Np != N else b2d

    footprint = (2 * (tm * tk * x_item + tk * tn * w_item + tn * 4
                      + tm * tn * x_item) + tm * tn * 4)
    limit = min(max(footprint + 16 * _MiB, 32 * _MiB), (cap * 3) // 4)

    grid = (Mp // tm, Np // tn, Kp // tk)
    out = pl.pallas_call(
        functools.partial(_tiled_linear_kernel, activation=activation,
                          compute_dtype=compute_dtype),
        out_shape=jax.ShapeDtypeStruct((Mp, Np), x.dtype),
        grid_spec=pltpu.PrefetchScalarGridSpec(
            num_scalar_prefetch=0,
            grid=grid,
            in_specs=[
                pl.BlockSpec((tm, tk), lambda i, j, k: (i, k)),
                pl.BlockSpec((tk, tn), lambda i, j, k: (k, j)),
                pl.BlockSpec((1, tn), lambda i, j, k: (0, j)),
            ],
            out_specs=pl.BlockSpec((tm, tn), lambda i, j, k: (i, j)),
            scratch_shapes=[pltpu.VMEM((tm, tn), jnp.float32)],
        ),
        compiler_params=pltpu.CompilerParams(
            dimension_semantics=("parallel", "parallel", "arbitrary"),
            vmem_limit_bytes=limit,
        ),
    )(xp, wp, bp)
    if Mp != M or Np != N:
        out = out[:M, :N]
    return out


# ==========================================================================
# Fused hidden MLP: L layers of y = act(y @ W_l + b_l) in ONE pallas_call.
# Activation stays resident in a f32 VMEM scratch; weights stream per layer.
# ==========================================================================
def _fused_hidden_kernel(x_ref, w_ref, b_ref, o_ref, act_ref, *, activation,
                         compute_dtype, layer_axis):
    l = pl.program_id(layer_axis)

    @pl.when(l == 0)
    def _():
        act_ref[...] = x_ref[...].astype(jnp.float32)

    y = jnp.dot(act_ref[...].astype(compute_dtype), w_ref[0],
                preferred_element_type=jnp.float32)
    y = y + b_ref[0].astype(jnp.float32)
    act_ref[...] = _apply_activation(y, activation)

    @pl.when(l == pl.num_programs(layer_axis) - 1)
    def _():
        o_ref[...] = act_ref[...].astype(o_ref.dtype)


def pallas_fused_hidden_mlp(x, w_stack, b_stack, activation, *,
                            compute_dtype=jnp.bfloat16):
    """w_stack: (L, H, H) pre-transposed (in, out); b_stack: (L, 1, H).

    Returns None if the fused layout does not fit the VMEM budget (caller
    falls back to per-layer pallas_linear)."""
    M, H = x.shape
    L = w_stack.shape[0]
    cap = _vmem_capacity_bytes()
    budget = (cap * 7) // 16   # ~28 MiB on v7x, ~56 MiB on v5e/v6e
    limit = (cap * 5) // 8     # ~40 MiB on v7x, ~80 MiB on v5e/v6e
    x_item = x.dtype.itemsize
    w_item = w_stack.dtype.itemsize

    def fused_bytes(tm_, h_):
        # double-buffered x/w/b/out blocks + resident f32 act scratch
        return (2 * (tm_ * h_ * x_item + h_ * h_ * w_item + h_ * 4
                     + tm_ * h_ * x_item) + tm_ * h_ * 4)

    kern = lambda layer_axis: functools.partial(
        _fused_hidden_kernel, activation=activation,
        compute_dtype=compute_dtype, layer_axis=layer_axis)
    cparams = lambda sem: pltpu.CompilerParams(
        dimension_semantics=sem, vmem_limit_bytes=limit)

    # ---- fast path: whole batch in one block, no padding at all ----------
    if fused_bytes(M, H) <= budget:
        split_two = (cap <= 64 * _MiB) and (M >= 256) and (M % 16 == 0)
        if split_two:
            # engage both v7x TensorCores; weights re-streamed once more/layer
            tm = M // 2
            return pl.pallas_call(
                kern(layer_axis=1),
                out_shape=jax.ShapeDtypeStruct((M, H), x.dtype),
                grid_spec=pltpu.PrefetchScalarGridSpec(
                    num_scalar_prefetch=0,
                    grid=(2, L),
                    in_specs=[
                        pl.BlockSpec((tm, H), lambda i, l: (i, 0)),
                        pl.BlockSpec((1, H, H), lambda i, l: (l, 0, 0)),
                        pl.BlockSpec((1, 1, H), lambda i, l: (l, 0, 0)),
                    ],
                    out_specs=pl.BlockSpec((tm, H), lambda i, l: (i, 0)),
                    scratch_shapes=[pltpu.VMEM((tm, H), jnp.float32)],
                ),
                compiler_params=cparams(("parallel", "arbitrary")),
            )(x, w_stack, b_stack)
        return pl.pallas_call(
            kern(layer_axis=0),
            out_shape=jax.ShapeDtypeStruct((M, H), x.dtype),
            grid_spec=pltpu.PrefetchScalarGridSpec(
                num_scalar_prefetch=0,
                grid=(L,),
                in_specs=[
                    pl.BlockSpec((M, H), lambda l: (0, 0)),
                    pl.BlockSpec((1, H, H), lambda l: (l, 0, 0)),
                    pl.BlockSpec((1, 1, H), lambda l: (l, 0, 0)),
                ],
                out_specs=pl.BlockSpec((M, H), lambda l: (0, 0)),
                scratch_shapes=[pltpu.VMEM((M, H), jnp.float32)],
            ),
            compiler_params=cparams(("arbitrary",)),
        )(x, w_stack, b_stack)

    # ---- general path: (8,128)-padded, batch possibly split into tiles ----
    Hp = _round_up(H, 128)
    tm_full = _round_up(M, 8)
    tm = tm_full
    while tm > 8 and fused_bytes(tm, Hp) > budget:
        tm = max(8, _round_up(tm // 2, 8))
    if fused_bytes(tm, Hp) > budget:
        return None  # whole (Hp,Hp) weight does not fit -> caller falls back
    if cap <= 64 * _MiB and tm == tm_full and tm >= 16:
        tm = _round_up(_cdiv(tm, 2), 8)  # split across the two v7x cores
    Mp = _round_up(M, tm)

    xp = jnp.pad(x, ((0, Mp - M), (0, Hp - H))) if (Mp != M or Hp != H) else x
    wp = (jnp.pad(w_stack, ((0, 0), (0, Hp - H), (0, Hp - H)))
          if Hp != H else w_stack)
    bp = (jnp.pad(b_stack, ((0, 0), (0, 0), (0, Hp - H)))
          if Hp != H else b_stack)

    out = pl.pallas_call(
        kern(layer_axis=1),
        out_shape=jax.ShapeDtypeStruct((Mp, Hp), x.dtype),
        grid_spec=pltpu.PrefetchScalarGridSpec(
            num_scalar_prefetch=0,
            grid=(Mp // tm, L),
            in_specs=[
                pl.BlockSpec((tm, Hp), lambda i, l: (i, 0)),
                pl.BlockSpec((1, Hp, Hp), lambda i, l: (l, 0, 0)),
                pl.BlockSpec((1, 1, Hp), lambda i, l: (l, 0, 0)),
            ],
            out_specs=pl.BlockSpec((tm, Hp), lambda i, l: (i, 0)),
            scratch_shapes=[pltpu.VMEM((tm, Hp), jnp.float32)],
        ),
        compiler_params=cparams(("parallel", "arbitrary")),
    )(xp, wp, bp)
    if Mp != M or Hp != H:
        out = out[:M, :H]
    return out


# ==========================================================================
# Module wrapper
# ==========================================================================
def _init_linear_params(key, in_features, out_features, dtype=jnp.float32):
    """nn.Linear-style init U(-1/sqrt(in), 1/sqrt(in)); weight stored
    PRE-TRANSPOSED as (in_features, out_features)."""
    kw, kb = jax.random.split(key)
    bound = float(in_features) ** -0.5
    w_t = jax.random.uniform(kw, (in_features, out_features), dtype, -bound, bound)
    b = jax.random.uniform(kb, (out_features,), dtype, -bound, bound)
    return w_t, b


class FullyConnectedHead:
    """JAX/Pallas port of rlbase FullyConnectedHead."""

    def __init__(self, hdim, outdim, nlayers, activation, out_activation, key,
                 param_dtype=jnp.float32, compute_dtype=jnp.bfloat16):
        self.hdim = hdim
        self.outdim = outdim
        self.nlayers = nlayers
        self.activation = activation          # "relu" / "tanh" / None
        self.out_activation = out_activation  # "relu" / "tanh" / None
        self.compute_dtype = compute_dtype

        keys = jax.random.split(key, nlayers)
        self.wt, self.b = [], []
        for i in range(nlayers - 1):
            w_t, b = _init_linear_params(keys[i], hdim, hdim, param_dtype)
            self.wt.append(w_t)
            self.b.append(b)
        w_t, b = _init_linear_params(keys[-1], hdim, outdim, param_dtype)
        self.wt.append(w_t)   # final layer params exist but (per the PyTorch
        self.b.append(b)      # quirk) are unused when nlayers > 1

        # bf16 compute copies of the weights (bf16 MXU feed, half DMA bytes);
        # biases stay f32 (v5e VPU has no bf16), reshaped once to (1, out).
        self.wt_c = [w.astype(compute_dtype) for w in self.wt]
        self.b2d = [bb.reshape(1, -1) for bb in self.b]

        if nlayers > 1:
            self.hidden_wt_c = jnp.stack(self.wt_c[:-1])                    # (L,H,H)
            self.hidden_b = jnp.stack(self.b[:-1]).reshape(nlayers - 1, 1, hdim)

    def _forward_2d(self, x):
        if self.nlayers > 1:
            out = pallas_fused_hidden_mlp(
                x, self.hidden_wt_c, self.hidden_b, self.activation,
                compute_dtype=self.compute_dtype)
            if out is not None:
                return out
            # TODO(synk): for hdim too large for a resident (H,H) weight block,
            # a fused kernel that K/N-tiles the weights via pltpu.emit_pipeline
            # would keep inter-layer activations out of HBM; for now fall back
            # to one tiled pallas_call per hidden layer.
            for l in range(self.nlayers - 1):
                x = pallas_linear(x, self.wt_c[l], self.b2d[l],
                                  activation=self.activation,
                                  compute_dtype=self.compute_dtype)
            return x
        # Single layer: apply it, then out_activation if present.
        return pallas_linear(x, self.wt_c[-1], self.b2d[-1],
                             activation=self.out_activation,
                             compute_dtype=self.compute_dtype)

    def __call__(self, x):
        lead = x.shape[:-1]
        out = self._forward_2d(x.reshape(-1, x.shape[-1]))
        return out.reshape(*lead, out.shape[-1])


def _ref_forward(head, x):
    """Pure-JAX reference (same bf16 weights as the kernels, f32 math)."""
    x = x.reshape(-1, x.shape[-1]).astype(jnp.float32)
    if head.nlayers > 1:
        for l in range(head.nlayers - 1):
            w = head.wt_c[l].astype(jnp.float32)
            x = _apply_activation(x @ w + head.b[l], head.activation)
        return x
    w = head.wt_c[-1].astype(jnp.float32)
    return _apply_activation(x @ w + head.b[-1], head.out_activation)


if __name__ == "__main__":
    key = jax.random.PRNGKey(0)
    k_x, k1, k2, k3, k_x3 = jax.random.split(key, 5)

    batch, hdim, outdim = 2, 32, 8
    x = jax.random.normal(k_x, (batch, hdim), dtype=jnp.float32)

    # Case 1: nlayers=3, activation=relu -> fused hidden stack (final layer
    # skipped, matching the original forward). Output (2, 32).
    head_multi = FullyConnectedHead(
        hdim=hdim, outdim=outdim, nlayers=3,
        activation="relu", out_activation=None, key=k1)
    y_multi = head_multi(x)
    jax.block_until_ready(y_multi)
    assert y_multi.shape == (batch, hdim), y_multi.shape
    assert jnp.allclose(y_multi, _ref_forward(head_multi, x),
                        atol=2e-2, rtol=2e-2)

    # Case 2: nlayers=1, out_activation=tanh -> single linear + tanh.
    head_single = FullyConnectedHead(
        hdim=hdim, outdim=outdim, nlayers=1,
        activation="relu", out_activation="tanh", key=k2)
    y_single = head_single(x)
    jax.block_until_ready(y_single)
    assert y_single.shape == (batch, outdim), y_single.shape
    assert jnp.allclose(y_single, _ref_forward(head_single, x),
                        atol=2e-2, rtol=2e-2)

    # Case 3: larger single layer to exercise the tiled / pipelined path.
    big_batch, big_h, big_out = 512, 2560, 1536
    x3 = jax.random.normal(k_x3, (big_batch, big_h), dtype=jnp.float32)
    head_big = FullyConnectedHead(
        hdim=big_h, outdim=big_out, nlayers=1,
        activation="relu", out_activation=None, key=k3)
    y_big = head_big(x3)
    jax.block_until_ready(y_big)
    assert y_big.shape == (big_batch, big_out), y_big.shape
    assert jnp.allclose(y_big, _ref_forward(head_big, x3),
                        atol=3e-2, rtol=3e-2)

    print("KERNEL_OK")
</pallas_src>

<mosaic_0001>
module attributes {stable_mosaic.version = 11 : i64} {
  func.func @_fused_hidden_kernel(%arg0: i32, %arg1: memref<2x32xf32, #tpu.memory_space<vmem>>, %arg2: memref<1x32x32xbf16, #tpu.memory_space<vmem>>, %arg3: memref<1x1x32xf32, #tpu.memory_space<vmem>>, %arg4: memref<2x32xf32, #tpu.memory_space<vmem>>, %arg5: memref<2x32xf32, #tpu.memory_space<vmem>>) attributes {dimension_semantics = [#tpu.dimension_semantics<arbitrary>], iteration_bounds = array<i64: 2>, scalar_prefetch = 0 : i64, scratch_operands = 1 : i64, tpu.core_type = #tpu.core_type<tc>, window_params = [{pipeline_mode = #tpu.pipeline_mode<synchronous>, transform_indices = @transform_0, window_bounds = array<i64: 2, 32>}, {transform_indices = @transform_1, window_bounds = array<i64: 1, 32, 32>}, {transform_indices = @transform_2, window_bounds = array<i64: 1, 1, 32>}, {pipeline_mode = #tpu.pipeline_mode<synchronous>, transform_indices = @transform_3, window_bounds = array<i64: 2, 32>}]} {
    %c0_i32 = arith.constant 0 : i32
    %0 = arith.cmpi eq, %arg0, %c0_i32 : i32
    %1 = arith.extui %0 : i1 to i32
    %c0_i32_0 = arith.constant 0 : i32
    %2 = arith.cmpi ne, %1, %c0_i32_0 : i32
    scf.if %2 {
      %c0_12 = arith.constant 0 : index
      %c0_13 = arith.constant 0 : index
      %18 = vector.load %arg1[%c0_12, %c0_13] : memref<2x32xf32, #tpu.memory_space<vmem>>, vector<2x32xf32>
      %c0_14 = arith.constant 0 : index
      %c0_15 = arith.constant 0 : index
      %19 = vector.load %arg5[%c0_14, %c0_15] : memref<2x32xf32, #tpu.memory_space<vmem>>, vector<2x32xf32>
      tpu.vector_store %arg5[%c0_14, %c0_15], %18 {strides = array<i32>} : memref<2x32xf32, #tpu.memory_space<vmem>>, vector<2x32xf32>,
    } else {
    }
    %c0 = arith.constant 0 : index
    %c0_1 = arith.constant 0 : index
    %3 = vector.load %arg5[%c0, %c0_1] : memref<2x32xf32, #tpu.memory_space<vmem>>, vector<2x32xf32>
    %4 = arith.truncf %3 : vector<2x32xf32> to vector<2x32xbf16>
    %c0_2 = arith.constant 0 : index
    %c0_3 = arith.constant 0 : index
    %c0_4 = arith.constant 0 : index
    %5 = vector.load %arg2[%c0_2, %c0_3, %c0_4] : memref<1x32x32xbf16, #tpu.memory_space<vmem>>, vector<1x32x32xbf16>
    %6 = vector.shape_cast %5 : vector<1x32x32xbf16> to vector<32x32xbf16>
    %cst = arith.constant dense<0.000000e+00> : vector<2x32xf32>
    %7 = tpu.matmul %4, %6, %cst {dimension_numbers = #tpu.dot_dimension_numbers<[1], [0], [0], [1], [0, 0, 1, 1], [], []>} : vector<2x32xbf16>, vector<32x32xbf16>, vector<2x32xf32> -> vector<2x32xf32>
    %c0_5 = arith.constant 0 : index
    %c0_6 = arith.constant 0 : index
    %c0_7 = arith.constant 0 : index
    %8 = vector.load %arg3[%c0_5, %c0_6, %c0_7] : memref<1x1x32xf32, #tpu.memory_space<vmem>>, vector<1x1x32xf32>
    %9 = vector.shape_cast %8 : vector<1x1x32xf32> to vector<1x32xf32>
    %10 = vector.broadcast %9 : vector<1x32xf32> to vector<2x32xf32>
    %11 = arith.addf %7, %10 : vector<2x32xf32>
    %cst_8 = arith.constant 0.000000e+00 : f32
    %12 = vector.broadcast %cst_8 : f32 to vector<2x32xf32>
    %13 = arith.maximumf %11, %12 : vector<2x32xf32>
    %c0_9 = arith.constant 0 : index
    %c0_10 = arith.constant 0 : index
    %14 = vector.load %arg5[%c0_9, %c0_10] : memref<2x32xf32, #tpu.memory_space<vmem>>, vector<2x32xf32>
    tpu.vector_store %arg5[%c0_9, %c0_10], %13 {strides = array<i32>} : memref<2x32xf32, #tpu.memory_space<vmem>>, vector<2x32xf32>,
    %c1_i32 = arith.constant 1 : i32
    %15 = arith.cmpi eq, %arg0, %c1_i32 : i32
    %16 = arith.extui %15 : i1 to i32
    %c0_i32_11 = arith.constant 0 : i32
    %17 = arith.cmpi ne, %16, %c0_i32_11 : i32
    scf.if %17 {
      %c0_12 = arith.constant 0 : index
      %c0_13 = arith.constant 0 : index
      %18 = vector.load %arg5[%c0_12, %c0_13] : memref<2x32xf32, #tpu.memory_space<vmem>>, vector<2x32xf32>
      %c0_14 = arith.constant 0 : index
      %c0_15 = arith.constant 0 : index
      %19 = vector.load %arg4[%c0_14, %c0_15] : memref<2x32xf32, #tpu.memory_space<vmem>>, vector<2x32xf32>
      tpu.vector_store %arg4[%c0_14, %c0_15], %18 {strides = array<i32>} : memref<2x32xf32, #tpu.memory_space<vmem>>, vector<2x32xf32>,
    } else {
    }
    return
  }
  func.func @transform_0(%arg0: i32) -> (i32, i32) {
    %c0_i32 = arith.constant 0 : i32
    %c0_i32_0 = arith.constant 0 : i32
    %c0_i32_1 = arith.constant 0 : i32
    return %c0_i32, %c0_i32_0 : i32, i32
  }
  func.func @transform_1(%arg0: i32) -> (i32, i32, i32) {
    %c0_i32 = arith.constant 0 : i32
    %c0_i32_0 = arith.constant 0 : i32
    %c0_i32_1 = arith.constant 0 : i32
    return %arg0, %c0_i32, %c0_i32_0 : i32, i32, i32
  }
  func.func @transform_2(%arg0: i32) -> (i32, i32, i32) {
    %c0_i32 = arith.constant 0 : i32
    %c0_i32_0 = arith.constant 0 : i32
    %c0_i32_1 = arith.constant 0 : i32
    return %arg0, %c0_i32, %c0_i32_0 : i32, i32, i32
  }
  func.func @transform_3(%arg0: i32) -> (i32, i32) {
    %c0_i32 = arith.constant 0 : i32
    %c0_i32_0 = arith.constant 0 : i32
    %c0_i32_1 = arith.constant 0 : i32
    return %c0_i32, %c0_i32_0 : i32, i32
  }
}

</mosaic_0001>

<bundles_post_ra>
// kernel: tpu_custom_call.1
= control target key start
LH: loop header
LB: loop body
LE: loop exit
PB: predicated region body
PF: predicated region fallthrough
CT: control target
= control target key end

     0   :  { %8 = vsyncpa [#allocation4], 0  ;;  %s787_s0 = inlined_call_operand.hbm [shape: f32[2,32], index: 0, kind: input, shape index: {}]   ;;  %s788_s1 = inlined_call_operand.hbm [shape: bf16[2,32,32], index: 1, kind: input, shape index: {}]   ;;  %s789_s2 = inlined_call_operand.hbm [shape: f32[2,1,32], index: 2, kind: input, shape index: {}]   ;;  %s790_s3 = inlined_call_operand.hbm [shape: f32[2,32], index: 3, kind: output, shape index: {}]  }
   0x1   :  { %9 = vsyncpa [#allocation7], 0 }
   0x2   :  { %11 = vsyncpa [#allocation7 + $0x1], 0 }
   0x3   :  { %12 = vsyncpa [#allocation5], 0  ;;  %s648_s12 = smov 0   ;;  %s650_s13 = smov 0  }
   0x4   :  { %s652_s14 = smov 0   ;;  %s654_s15 = smov 0  }
   0x5 LB: > { %s669_s16 = sadd.s32 1, %s622_s15   ;;  %s46_s17 = sadd.s32 1, %s618_s14  ;;  %s622_s15 = sphi %s654_s15, %s797_s15   ;;  %s618_s14 = sphi %s652_s14, %s796_s14   ;;  %s614_s13 = sphi %s650_s13, %s795_s13   ;;  %s610_s12 = sphi %s648_s12, %s794_s12  }
   0x6   : > { %s43_s18 = ssub.s32 %s622_s15, %s669_s16  ;;  %p53_p0 = scmp.ne.s32.totalorder %s618_s14, %s614_s13 }
   0x7   : > { %p44_p1 = scmp.eq.s32.totalorder %s43_s18, 0  ;;  %p54_p2 = scmp.eq.s32.totalorder %s622_s15, 0 }
   0x8   : > { %p421_p3 = scmp.lt.s32.totalorder %s622_s15, 2  ;;  %s142_s20 = sand.u32 1, %s622_s15  }
   0x9   : > { %s679_s19 = scalar_select %p44_p1, %s618_s14, %s46_s17  }
   0xa   : > { %p55_p4 = por %p54_p2, %p53_p0  ;;  %s144_s21 = sand.u32 1, %s618_s14  }
   0xb   : > { %s373_s22 = sshll.u32 %s144_s21, 4  ;;  %s394_s23 = sshll.u32 %s622_s15, 4 }
   0xc   : > { %s151_s26 = scalar_lea.hbm %s788_s1, %s394_s23  ;;  %s146_s28 = scalar_lea.vmem [#allocation6], %s373_s22 }
   0xd   : > { %s152_s27 = sshll.u32 %s151_s26, 4  ;;  %s154_s29 = sshll.u32 %s146_s28, 4  ;;  %s153_s27 = int_to_ptr.hbm [resolvable:$true] %s152_s27  ;;  %s155_s29 = int_to_ptr.vmem [resolvable:$true] %s154_s29 }
   0xe   : > { %p691_p5 = pnand %p421_p3, %p55_p4  ;;  %s695_s4 = scalar_lea.sflag [#allocation7], %s142_s20 }
   0xf   : > { %s462_s5 = sshra.s32 %s153_s27, 4  ;;  %s469_s9 = scalar_lea.hbm %s788_s1, 32  ;;  %s463_s5 = int_to_ptr.hbm [resolvable:$true] %s462_s5 }
  0x10   : > { %s464_s6 = scalar_lea.hbm %s463_s5, 16  ;;  %p466_p7 = pneg %p691_p5 }
  0x11   : > { %p465_p6 = scmp.ne.s32.totalorder %s463_s5, %s464_s6  ;;  %p470_p10 = scmp.lt.s32.totalorder %s463_s5, %s788_s1 }
  0x12   : > { %p471_p11 = scmp.lt.s32.totalorder %s469_s9, %s464_s6 }
  0x13   : > { %p467_p8 = pnand %p466_p7, %p465_p6 }
  0x14   : > { %p472_p12 = por %p471_p11, %p470_p10 }
  0x15   : > { %p468_p9 = pneg %p467_p8 }
  0x17   : > { %p473_p13 = pnand %p472_p12, %p468_p9 }
  0x19   : > { %476 = shalt.err (!%p473_p13)
}
  0x1a   : > { %s624_s17 = smov 64   ;;  %s625_s18 = smov 4  }
  0x1b   : > { %416 = dma.hbm_to_vmem [thread:$0]  (!%p691_p5), %s153_s27, 256, %s155_s29, %s695_s4, %s624_s17, %s624_s17, %s625_s18  }
  0x1c   : > { %s712_s20 = sadd.s32 4294967295, %s622_s15   ;;  %p59_p0 = scmp.ne.s32.totalorder %s614_s13, %s610_s12 }
  0x1d   : > { %p60_p1 = scmp.eq.s32.totalorder %s712_s20, 0  ;;  %p370_p2 = scmp.ge.s32.totalorder %s622_s15, 1 }
  0x1e   : > { %p117_p3 = scmp.lt.s32.totalorder %s622_s15, 3  ;;  %p371_p4 = scmp.ne.s32.totalorder %s712_s20, 0 }
  0x1f   : > { %p722_p6 = por %p60_p1, %p59_p0  ;;  %s129_s25 = sshll.u32 %s787_s0, 4  ;;  %s130_s25 = int_to_ptr.hbm [resolvable:$true] %s129_s25 }
  0x20   : > { %p729_p8 = pnand %p370_p2, %p117_p3  ;;  %s626_s12 = smov [#allocation3]  }
  0x21   : > { %s131_s27 = sshll.u32 %s626_s12, 4  ;;  %s170_s5 = scalar_lea.hbm %s789_s2, %s622_s15  ;;  %s132_s27 = int_to_ptr.vmem [resolvable:$true] %s131_s27 }
  0x22   : > { %p409_p9 = pneg %p729_p8  ;;  %s172_s6 = sshll.u32 %s170_s5, 4  ;;  %s173_s6 = int_to_ptr.hbm [resolvable:$true] %s172_s6 }
  0x23   : > { %s167_s7 = scalar_lea.vmem [#allocation8], %s144_s21  ;;  %s522_s9 = sshra.s32 %s173_s6, 4  ;;  %s523_s9 = int_to_ptr.hbm [resolvable:$true] %s522_s9 }
  0x24   : > { %p410_p10 = pnand %p409_p9, %p60_p1  ;;  %s174_s8 = sshll.u32 %s167_s7, 4  ;;  %s175_s8 = int_to_ptr.vmem [resolvable:$true] %s174_s8 }
  0x25   : > { %s524_s10 = scalar_lea.hbm %s523_s9, 1  ;;  %s529_s15 = scalar_lea.hbm %s789_s2, 2 }
  0x26   : > { %412 = dma.hbm_to_vmem [thread:$0]  (!%p410_p10), %s130_s25, 32, %s132_s27, [#allocation4]  }
  0x27   : > { %p525_p11 = scmp.ne.s32.totalorder %s523_s9, %s524_s10  ;;  %p530_p0 = scmp.lt.s32.totalorder %s523_s9, %s789_s2 }
  0x28   : > { %p531_p2 = scmp.lt.s32.totalorder %s529_s15, %s524_s10 }
  0x29   : > { %p527_p12 = pnand %p525_p11, %p466_p7 }
  0x2a   : > { %p532_p3 = por %p531_p2, %p530_p0 }
  0x2b   : > { %p528_p13 = pneg %p527_p12 }
  0x2d   : > { %p533_p9 = pnand %p532_p3, %p528_p13 }
  0x2f   : > { %536 = shalt.err (!%p533_p9)
}
  0x30   : > { %419 = dma.hbm_to_vmem [thread:$0]  (!%p691_p5), %s173_s6, 16, %s175_s8, %s695_s4  }
  0x31   : > { %183 = sbr.rel (%p729_p8) target bundleno = 219 (0xdb), region = 32 }
  0x36   : > { %597 = dma.done.wait (%p60_p1), [#allocation4], 32  }
  0x37   : > { %599 = vsyncadd (%p60_p1), [#allocation4], 4294967264  ;;  %s190_s21 = sand.u32 1, %s712_s20   ;;  %s192_s24 = sand.u32 1, %s614_s13  }
  0x38   : > { %s378_s25 = sshll.u32 %s192_s24, 4  ;;  %s191_s12 = scalar_lea.sflag [#allocation7], %s190_s21 }
  0x39   : > { %s194_s27 = scalar_lea.vmem [#allocation6], %s378_s25 }
  0x3a   : > { %601 = dma.done.wait (%p722_p6), %s191_s12, 272  }
  0x3b   : > { %603 = vsyncadd (%p722_p6), %s191_s12, 4294967024  ;;  %s203_s30 = scalar_lea.vmem [#allocation8], %s192_s24  ;;  %230 = sbr.rel (%p371_p4) target bundleno = 66 (0x42), region = 48 }
  0x40   : > { %v231_v0 = vld [vmem:[#allocation3] sm:$0x3]  ;;  %vm232_vm0 = vcmask 254976  }
  0x41   : > { %233 = vst.msk [vmem:[#allocation2] sm:$0x3] %vm232_vm0, %v231_v0 }
  0x42 PF: > { %v396_v1 = vld [vmem:[%s194_s27 + $0x8] sm:$0xff]  ;;  %v395_v2 = vld [vmem:[%s194_s27] sm:$0xff]  ;;  %vm256_vm1 = vcmask 261120   ;;  %vm274_vm2 = vcmask 254976   ;;  %p389_p5 = scmp.ne.s32.totalorder %s712_s20, 1 }
  0x43   : > { %266 = vmatpush.bf16.msra.mxu0 %v396_v1  ;;  %v461_v5 = vld [vmem:[%s203_s30] ss:$0 sm:$0xff] }
  0x47   : > { %267 = vmatpush.bf16.msra.mxu0 %v395_v2 }
  0x48   : > { %v234_v3 = vld [vmem:[#allocation2] sm:$0x3] }
  0x49   : > { %v235_v4 = vpack.c.bf16 %v234_v3, %v234_v3 }
  0x4b   : > { %388 = vmatmul.msk.bf16.vlgmr.msra.gmra.mxu0 %vm256_vm1, %v235_v4 }
  0xc8   : > { %v269_v6 = vpop.f32.mrf.mxu0 }
  0xc9   : > { %v270_v7 = vadd.f32 %v461_v5, %v269_v6 }
  0xcb   : > { %v273_v8 = vmax.f32 %v270_v7, 0.0 }
  0xcc   : > { %279 = sbr.rel (%p389_p5) target bundleno = 214 (0xd6), region = 52 }
  0xcd   : > { %275 = vst.msk [vmem:[#allocation2] sm:$0x3] %vm274_vm2, %v273_v8 }
  0xd0   : > { %v271_v9 = vpop.f32.mrf.mxu0 }
  0xd4   : > { %v280_v10 = vld [vmem:[#allocation2] sm:$0x3] }
  0xd5   : > { %281 = vst.msk [vmem:[#allocation9] sm:$0x3] %vm274_vm2, %v280_v10 }
  0xd6 PF: > { %p423_p7 = scmp.eq.s32.totalorder %s712_s20, 1  ;;  %s627_s4 = smov [#allocation9]  }
  0xd7   : > { %s288_s22 = sshll.u32 %s627_s4, 4  ;;  %s290_s29 = sshll.u32 %s790_s3, 4  ;;  %s289_s22 = int_to_ptr.vmem [resolvable:$true] %s288_s22  ;;  %s291_s29 = int_to_ptr.hbm [resolvable:$true] %s290_s29 }
  0xd8   : > { %406 = dma.vmem_to_hbm [thread:$0]  (%p423_p7), %s289_s22, 32, %s291_s29, [#allocation5]  }
  0xd9   : > { %605 = dma.done.wait (%p423_p7), [#allocation5], 32  }
  0xda   : > { %607 = vsyncadd (%p423_p7), [#allocation5], 4294967264 }
  0xdb PF: > { %p15_p1 = scmp.ge.s32.totalorder %s669_s16, 4   ;;  %s794_s12 = smov %s614_s13 }
  0xdc   : > { %s795_s13 = smov %s618_s14  ;;  %s796_s14 = smov %s679_s19 }
  0xdd   : > { %s797_s15 = smov %s669_s16  ;;  %17 = sbr.rel (!%p15_p1) target bundleno = 5 (0x5), region = 93 }
  0xe2   :  { %304 = vsyncpa [#allocation4], 1 }
  0xe3   :  { %306 = vsyncpa [#allocation4 + $0x1], 1 }
  0xe4   :  { %307 = vsyncpa [#allocation7], 1 }
  0xe5   :  { %309 = vsyncpa [#allocation7 + $0x1], 1 }
  0xe6   :  { %310 = vsyncpa [#allocation5], 1 }
  0xe7   :  { %312 = vsyncpa [#allocation5 + $0x1], 1 }

</bundles_post_ra>
